<compile_context>
chip_gen: v7x
topology: tpu7x:2x2x1
jax: 0.10.0
libtpu: 0.0.40
codegen_flags: <defaults>
</compile_context>

<pallas_src>
import functools

import jax
import jax.numpy as jnp
from jax import lax
from jax.experimental import pallas as pl
from jax.experimental.pallas import tpu as pltpu


def _tpu_generation_params():
    """(target_tile_bytes_f32, vmem_limit_cap, bf16_tail_ok) per TPU generation."""
    kind = ""
    try:
        kind = jax.devices()[0].device_kind.lower()
    except Exception:
        pass
    if "v7" in kind:
        # v7x: 64 MiB physical VMEM per TensorCore — stay conservative.
        return (2 << 20), (32 << 20), True
    # v5e has no bf16 VALU; narrowing the tail there would just re-widen.
    bf16_tail_ok = not ("v5e" in kind or "v5 lite" in kind or "v5lite" in kind)
    # v5e/v6e: 128 MiB physical VMEM — bigger tiles / limit are free headroom.
    return (4 << 20), (48 << 20), bf16_tail_ok


def _choose_tile_hw(hw, c, b, target_bytes):
    """Lane-dim tile: multiple of 128, sized by the f32 working set, capped so
    the grid has >= 4 points (2-TensorCore sharding on v7x)."""
    if hw <= 128:
        return hw                                       # full-extent block
    hw_pad = pl.cdiv(hw, 128) * 128
    t = (target_bytes // max(c * 4, 1)) // 128 * 128    # f32 working set
    t = max(128, min(t, hw_pad))
    need_tiles = pl.cdiv(4, max(b, 1))                  # b * tiles >= 4
    if need_tiles > 1:
        cap = pl.cdiv(pl.cdiv(hw, need_tiles), 128) * 128
        t = max(128, min(t, cap))
    return t


def _make_ln_kernel(with_bias, bf16_tail_ok):
    def kernel(*refs):
        if with_bias:
            x_ref, w_ref, b_ref, o_ref = refs
        else:
            x_ref, w_ref, o_ref = refs
            b_ref = None
        x = x_ref[...].astype(jnp.float32)               # (C, T)
        inv_c = jnp.float32(1.0 / x.shape[0])
        # Single pass: sum and sum-of-squares (x stays in vregs; no centered
        # full-block temporary round-tripped through VMEM).
        mu = jnp.sum(x, axis=0, keepdims=True) * inv_c   # (1, T)
        ex2 = jnp.sum(x * x, axis=0, keepdims=True) * inv_c
        var = jnp.maximum(ex2 - mu * mu, 0.0)            # torch var(unbiased=False)
        inv = lax.rsqrt(var + 1e-5)                      # (1, T)
        if with_bias:
            xn = (x - mu) * inv
        else:
            xn = x * inv                                 # BiasFree: divide x, not x-mu
        if bf16_tail_ok and o_ref.dtype == jnp.bfloat16:
            # Scale/shift in bf16 before the store (halves tail vreg pressure
            # on chips with a bf16 VALU).
            y = xn.astype(jnp.bfloat16) * w_ref[...].astype(jnp.bfloat16)
            if with_bias:
                y = y + b_ref[...].astype(jnp.bfloat16)
            o_ref[...] = y
        else:
            y = xn * w_ref[...].astype(jnp.float32)      # (C,1) lane-broadcast
            if with_bias:
                y = y + b_ref[...].astype(jnp.float32)
            o_ref[...] = y.astype(o_ref.dtype)
    return kernel


def _layernorm_nc_hw(x3, weight, bias):
    """x3: (B, C, HW). LayerNorm over C at each (batch, spatial) position."""
    B, C, HW = x3.shape
    itemsize = jnp.dtype(x3.dtype).itemsize
    target_bytes, vmem_cap, bf16_tail_ok = _tpu_generation_params()
    tile_hw = _choose_tile_hw(HW, C, B, target_bytes)
    grid = (B, pl.cdiv(HW, tile_hw))

    x_spec = pl.BlockSpec((None, C, tile_hw), lambda b, j: (b, 0, j))
    # TODO(synk): if a profile shows exposed DMA for large-C (strided) input
    # blocks, retry with pipeline_mode=pl.Buffered(3) on x_spec.
    p_spec = pl.BlockSpec((C, 1), lambda b, j: (0, 0))
    o_spec = pl.BlockSpec((None, C, tile_hw), lambda b, j: (b, 0, j))

    # VMEM budget: double-buffered in + out blocks at the activation dtype,
    # plus ~4 full-block f32 intermediates, plus headroom for params/descriptors.
    io_block = C * tile_hw * itemsize
    f32_block = C * tile_hw * 4
    vmem_limit = 4 * io_block + 4 * f32_block + (2 << 20)
    vmem_limit = int(min(max(vmem_limit, 8 << 20), vmem_cap))
    cparams = pltpu.CompilerParams(
        dimension_semantics=("parallel", "parallel"),
        vmem_limit_bytes=vmem_limit)

    with_bias = bias is not None
    kernel = _make_ln_kernel(with_bias, bf16_tail_ok)

    operands = [x3, weight.reshape(C, 1).astype(jnp.float32)]
    in_specs = [x_spec, p_spec]
    if with_bias:
        operands.append(bias.reshape(C, 1).astype(jnp.float32))
        in_specs.append(p_spec)

    return pl.pallas_call(
        kernel,
        out_shape=jax.ShapeDtypeStruct((B, C, HW), x3.dtype),
        grid_spec=pltpu.PrefetchScalarGridSpec(
            num_scalar_prefetch=0,
            grid=grid,
            in_specs=in_specs,
            out_specs=o_spec),
        compiler_params=cparams,
    )(*operands)


@functools.partial(jax.jit, static_argnames=("layernorm_type",))
def layernorm_nchw(x, weight, bias, layernorm_type="WithBias"):
    """Equivalent of LayerNorm(dim, LayerNorm_type).forward(x) for NCHW x."""
    B, C, H, W = x.shape
    HW = H * W
    b = None if layernorm_type == "BiasFree" else bias
    x3 = x.reshape(B, C, HW)                         # free view — no transpose
    if HW < 128 and B > 1:
        # Small-HW regime: fold the batch into the lane axis (one-time XLA
        # transpose) so stores stay lane-dense instead of heavily masked.
        xt = jnp.transpose(x3, (1, 0, 2)).reshape(1, C, B * HW)
        yt = _layernorm_nc_hw(xt, weight, b)
        y3 = jnp.transpose(yt.reshape(C, B, HW), (1, 0, 2))
    else:
        y3 = _layernorm_nc_hw(x3, weight, b)
    return y3.reshape(B, C, H, W)


def _reference(x, weight, bias, layernorm_type):
    xf = x.astype(jnp.float32)
    mu = jnp.mean(xf, axis=1, keepdims=True)
    var = jnp.mean((xf - mu) ** 2, axis=1, keepdims=True)
    w = weight.reshape(1, -1, 1, 1).astype(jnp.float32)
    if layernorm_type == "BiasFree":
        y = xf / jnp.sqrt(var + 1e-5) * w
    else:
        y = (xf - mu) / jnp.sqrt(var + 1e-5) * w \
            + bias.reshape(1, -1, 1, 1).astype(jnp.float32)
    return y.astype(x.dtype)


if __name__ == "__main__":
    key = jax.random.PRNGKey(0)
    ok = True
    # Shapes: 128-aligned spatial, a non-aligned spatial tail (masked boundary
    # writes), and a small-HW case that exercises the batch->lane fold path.
    # NOTE: realistic RDN dims (C=48..384) should be used for perf tuning;
    # these small shapes are for correctness only.
    for (B, C, H, W) in ((2, 4, 16, 16), (1, 6, 18, 18), (2, 8, 8, 8)):
        key, kx, kw, kb = jax.random.split(key, 4)
        x = jax.random.normal(kx, (B, C, H, W), dtype=jnp.float32)
        weight = 1.0 + 0.1 * jax.random.normal(kw, (C,), dtype=jnp.float32)
        bias = 0.1 * jax.random.normal(kb, (C,), dtype=jnp.float32)
        for ln_type in ("WithBias", "BiasFree"):
            out = layernorm_nchw(x, weight, bias, layernorm_type=ln_type)
            out = jax.block_until_ready(out)
            ref = _reference(x, weight, bias, ln_type)
            if not jnp.allclose(out, ref, atol=1e-4, rtol=1e-4):
                ok = False

    if ok:
        print("KERNEL_OK")
</pallas_src>

<mosaic_0001>
module attributes {stable_mosaic.version = 11 : i64} {
  func.func @kernel(%arg0: i32, %arg1: i32, %arg2: memref<1x4x128xf32, #tpu.memory_space<vmem>>, %arg3: memref<4x1xf32, #tpu.memory_space<vmem>>, %arg4: memref<4x1xf32, #tpu.memory_space<vmem>>, %arg5: memref<1x4x128xf32, #tpu.memory_space<vmem>>) attributes {dimension_semantics = [#tpu.dimension_semantics<parallel>, #tpu.dimension_semantics<parallel>], iteration_bounds = array<i64: 2, 2>, scalar_prefetch = 0 : i64, scratch_operands = 0 : i64, tpu.core_type = #tpu.core_type<tc>, window_params = [{transform_indices = @transform_0, window_bounds = array<i64: 1, 4, 128>}, {pipeline_mode = #tpu.pipeline_mode<synchronous>, transform_indices = @transform_1, window_bounds = array<i64: 4, 1>}, {pipeline_mode = #tpu.pipeline_mode<synchronous>, transform_indices = @transform_2, window_bounds = array<i64: 4, 1>}, {transform_indices = @transform_3, window_bounds = array<i64: 1, 4, 128>}]} {
    %c0 = arith.constant 0 : index
    %c0_0 = arith.constant 0 : index
    %c0_1 = arith.constant 0 : index
    %0 = vector.load %arg2[%c0, %c0_0, %c0_1] : memref<1x4x128xf32, #tpu.memory_space<vmem>>, vector<1x4x128xf32>
    %1 = vector.shape_cast %0 : vector<1x4x128xf32> to vector<4x128xf32>
    %cst = arith.constant dense<0.000000e+00> : vector<128xf32>
    %2 = vector.multi_reduction <add>, %1, %cst [0] : vector<4x128xf32> to vector<128xf32>
    %3 = vector.shape_cast %2 : vector<128xf32> to vector<1x128xf32>
    %cst_2 = arith.constant 2.500000e-01 : f32
    %4 = vector.broadcast %cst_2 : f32 to vector<1x128xf32>
    %5 = arith.mulf %3, %4 : vector<1x128xf32>
    %6 = arith.mulf %1, %1 : vector<4x128xf32>
    %cst_3 = arith.constant dense<0.000000e+00> : vector<128xf32>
    %7 = vector.multi_reduction <add>, %6, %cst_3 [0] : vector<4x128xf32> to vector<128xf32>
    %8 = vector.shape_cast %7 : vector<128xf32> to vector<1x128xf32>
    %cst_4 = arith.constant 2.500000e-01 : f32
    %9 = vector.broadcast %cst_4 : f32 to vector<1x128xf32>
    %10 = arith.mulf %8, %9 : vector<1x128xf32>
    %11 = arith.mulf %5, %5 : vector<1x128xf32>
    %12 = arith.subf %10, %11 : vector<1x128xf32>
    %cst_5 = arith.constant 0.000000e+00 : f32
    %13 = vector.broadcast %cst_5 : f32 to vector<1x128xf32>
    %14 = arith.maximumf %12, %13 : vector<1x128xf32>
    %cst_6 = arith.constant 9.99999974E-6 : f32
    %15 = vector.broadcast %cst_6 : f32 to vector<1x128xf32>
    %16 = arith.addf %14, %15 : vector<1x128xf32>
    %17 = math.rsqrt %16 : vector<1x128xf32>
    %18 = vector.broadcast %5 : vector<1x128xf32> to vector<4x128xf32>
    %19 = arith.subf %1, %18 : vector<4x128xf32>
    %20 = vector.broadcast %17 : vector<1x128xf32> to vector<4x128xf32>
    %21 = arith.mulf %19, %20 : vector<4x128xf32>
    %c0_7 = arith.constant 0 : index
    %c0_8 = arith.constant 0 : index
    %22 = vector.load %arg3[%c0_7, %c0_8] : memref<4x1xf32, #tpu.memory_space<vmem>>, vector<4x1xf32>
    %23 = vector.broadcast %22 : vector<4x1xf32> to vector<4x128xf32>
    %24 = arith.mulf %21, %23 : vector<4x128xf32>
    %c0_9 = arith.constant 0 : index
    %c0_10 = arith.constant 0 : index
    %25 = vector.load %arg4[%c0_9, %c0_10] : memref<4x1xf32, #tpu.memory_space<vmem>>, vector<4x1xf32>
    %26 = vector.broadcast %25 : vector<4x1xf32> to vector<4x128xf32>
    %27 = arith.addf %24, %26 : vector<4x128xf32>
    %c0_11 = arith.constant 0 : index
    %c0_12 = arith.constant 0 : index
    %c0_13 = arith.constant 0 : index
    %28 = vector.load %arg5[%c0_11, %c0_12, %c0_13] : memref<1x4x128xf32, #tpu.memory_space<vmem>>, vector<1x4x128xf32>
    %29 = vector.shape_cast %28 : vector<1x4x128xf32> to vector<4x128xf32>
    %30 = vector.shape_cast %27 : vector<4x128xf32> to vector<1x4x128xf32>
    tpu.vector_store %arg5[%c0_11, %c0_12, %c0_13], %30 {strides = array<i32>} : memref<1x4x128xf32, #tpu.memory_space<vmem>>, vector<1x4x128xf32>,
    return
  }
  func.func @transform_0(%arg0: i32, %arg1: i32) -> (i32, i32, i32) {
    %c0_i32 = arith.constant 0 : i32
    %c0_i32_0 = arith.constant 0 : i32
    return %arg0, %c0_i32, %arg1 : i32, i32, i32
  }
  func.func @transform_1(%arg0: i32, %arg1: i32) -> (i32, i32) {
    %c0_i32 = arith.constant 0 : i32
    %c0_i32_0 = arith.constant 0 : i32
    %c0_i32_1 = arith.constant 0 : i32
    return %c0_i32, %c0_i32_0 : i32, i32
  }
  func.func @transform_2(%arg0: i32, %arg1: i32) -> (i32, i32) {
    %c0_i32 = arith.constant 0 : i32
    %c0_i32_0 = arith.constant 0 : i32
    %c0_i32_1 = arith.constant 0 : i32
    return %c0_i32, %c0_i32_0 : i32, i32
  }
  func.func @transform_3(%arg0: i32, %arg1: i32) -> (i32, i32, i32) {
    %c0_i32 = arith.constant 0 : i32
    %c0_i32_0 = arith.constant 0 : i32
    return %arg0, %c0_i32, %arg1 : i32, i32, i32
  }
}

</mosaic_0001>

<bundles_post_ra>
// kernel: layernorm_nchw.1
= control target key start
LH: loop header
LB: loop body
LE: loop exit
PB: predicated region body
PF: predicated region fallthrough
CT: control target
= control target key end

     0   :  { %s445_s12 = smov 0   ;;  %s447_s13 = smov 0   ;;  %s509_s0 = inlined_call_operand.vmem [shape: f32[2,4,256], index: 0, kind: input, shape index: {}]   ;;  %s510_s1 = inlined_call_operand.vmem [shape: f32[4,1], index: 1, kind: input, shape index: {}]   ;;  %s511_s2 = inlined_call_operand.vmem [shape: f32[4,1], index: 2, kind: input, shape index: {}]   ;;  %s512_s3 = inlined_call_operand.vmem [shape: f32[2,4,256], index: 3, kind: output, shape index: {}]  }
   0x1   :  { %s449_s14 = smov 0   ;;  %s451_s15 = smov 0  }
   0x2   :  { %s453_s16 = smov 0  }
   0x3 LB: > { %s22_s17 = sadd.s32 1, %s414_s14  ;;  %s25_s18 = sadd.s32 1, %s418_s15  ;;  %s422_s16 = sphi %s453_s16, %s13_s16   ;;  %s418_s15 = sphi %s451_s15, %s516_s15   ;;  %s414_s14 = sphi %s449_s14, %s515_s14   ;;  %s410_s13 = sphi %s447_s13, %s514_s13   ;;  %s406_s12 = sphi %s445_s12, %s513_s12  }
   0x4   : > { %p23_p0 = scmp.ge.s32.totalorder %s22_s17, 2  ;;  %p333_p1 = scmp.ge.s32.totalorder %s422_s16, 1 }
   0x5   : > { %p156_p2 = scmp.lt.s32.totalorder %s422_s16, 5 }
   0x6   : > { %s518_s17 = smov (%p23_p0, %s22_s17), 0  ;;  %s520_s18 = smov (!%p23_p0, %s25_s18), %s418_s15 }
   0x7   : > { %p157_p3 = pnand %p333_p1, %p156_p2  ;;  %p27_p4 = scmp.ge.s32.totalorder %s520_s18, 2 }
   0x8   : > { %v228_v0 = vld [vmem:[%s510_s1] sm:$0xf] (!%p157_p3)  ;;  %v424_v1 = vmov (!%p157_p3), 0   ;;  %p186_p5 = scmp.lt.s32.totalorder (!%p157_p3), %s410_s13, 1  ;;  %p188_p6 = scmp.lt.s32.totalorder (!%p157_p3), %s406_s12, 1  ;;  %vm203_vm0 = vcmask (!%p157_p3), 1043456  }
   0x9   : > { %s522_s18 = smov (%p27_p4, %s520_s18), 0  ;;  %160 = sbr.rel (%p157_p3) target bundleno = 146 (0x92), region = 32 }
   0xa   : > { %381 = vset.pattern.permute.xlu0 (!%p157_p3), %v424_v1  ;;  %v235_v2 = vld [vmem:[%s511_s2] sm:$0xf] (!%p157_p3) }
   0xb   : > { %231 = vperm.xlu0 (!%p157_p3), %381, %v228_v0  }
   0xf   : > { %238 = vperm.xlu0 (!%p157_p3), %381, %v235_v2  }
  0x10   : > { %s524_s13 = smov (!%p186_p5, %s410_s13), 1  ;;  %s526_s12 = smov (!%p188_p6, %s406_s12), 1 }
  0x11   : > { %s334_s23 = sshll.u32 %s524_s13, 1 }
  0x12   : > { %s481_s24 = sadd.s32 %s334_s23, %s526_s12 }
  0x13   : > { %s335_s25 = sshll.u32 %s481_s24, 2 }
  0x14   : > { %s193_s28 = scalar_lea.vmem %s509_s0, %s335_s25  ;;  %s201_s4 = scalar_lea.vmem %s512_s3, %s335_s25 }
  0x15   : > { %v202_v3 = vld [vmem:[%s193_s28] sm:$0xf] }
  0x16   : > { %v204_v4 = vsel %vm203_vm0, %v202_v3, 0.0  ;;  %v212_v5 = vmul.f32 %v202_v3, %v202_v3 }
  0x17   : > { %v205_v6 = vrot.slane %v204_v4, 4 }
  0x18   : > { %v213_v7 = vsel %vm203_vm0, %v212_v5, 0.0 }
  0x19   : > { %v206_v8 = vadd.f32 %v205_v6, %v204_v4  ;;  %v214_v9 = vrot.slane %v213_v7, 4 }
  0x1b   : > { %v207_v10 = vrot.slane %v206_v8, 2  ;;  %v215_v11 = vadd.f32 %v214_v9, %v213_v7 }
  0x1d   : > { %v208_v12 = vadd.f32 %v207_v10, %v206_v8  ;;  %v216_v13 = vrot.slane %v215_v11, 2 }
  0x1f   : > { %v209_v14 = vrot.slane %v208_v12, 1  ;;  %v217_v15 = vadd.f32 %v216_v13, %v215_v11 }
  0x21   : > { %v210_v16 = vadd.f32 %v209_v14, %v208_v12  ;;  %v218_v17 = vrot.slane %v217_v15, 1 }
  0x23   : > { %v211_v18 = vmul.f32 0.25, %v210_v16  ;;  %v219_v19 = vadd.f32 %v218_v17, %v217_v15 }
  0x25   : > { %v220_v20 = vmul.f32 0.25, %v219_v19  ;;  %v221_v21 = vmul.f32 %v211_v18, %v211_v18  ;;  %v226_v25 = vsub.f32 %v202_v3, %v211_v18 }
  0x27   : > { %v222_v22 = vsub.f32 %v220_v20, %v221_v21 }
  0x29   : > { %v223_v23 = vmax.f32 %v222_v22, 0.0 }
  0x2b   : > { %v224_v24 = vadd.f32 1e-05, %v223_v23 }
  0x2d   : > { %382 = vrsqrt.f32 %v224_v24 }
  0x37   : > { %v383_v26 = vpop.eup %382 }
  0x38   : > { %v227_v27 = vmul.f32 %v383_v26, %v226_v25 }
  0x8a   : > { %v232_v28 = vpop.permute.xlu0 %231 }
  0x8b   : > { %v234_v29 = vmul.f32 %v232_v28, %v227_v27 }
  0x8e   : > { %v239_v30 = vpop.permute.xlu0 %238 }
  0x8f   : > { %v241_v31 = vadd.f32 %v239_v30, %v234_v29 }
  0x91   : > { %242 = vst [vmem:[%s201_s4] sm:$0xf] %v241_v31 }
  0x92 PF: > { %s13_s16 = sadd.s32 1, %s422_s16   ;;  %s513_s12 = smov %s414_s14 }
  0x93   : > { %p10_p7 = scmp.ge.s32.totalorder %s13_s16, 6   ;;  %s514_s13 = smov %s418_s15 }
  0x94   : > { %s515_s14 = smov %s518_s17  ;;  %s516_s15 = smov %s522_s18 }
  0x95   :  { %12 = sbr.rel (!%p10_p7) target bundleno = 3 (0x3), region = 62 }

</bundles_post_ra>
